<compile_context>
chip_gen: v7x
topology: tpu7x:2x2x1
jax: 0.10.0
libtpu: 0.0.40
codegen_flags: <defaults>
</compile_context>

<pallas_src>
import functools

import jax
import jax.numpy as jnp
from jax.experimental import pallas as pl
from jax.experimental.pallas import tpu as pltpu


def cross_attn_kernel(local_ref, glob_ref, wln_ref, wgn_ref, wq_ref, wkv_ref,
                      wp_ref, wo_ref, out_ref, *, n_head, eps):
    _, tq, E = local_ref.shape            # one batch element, tq query rows
    Tg = glob_ref.shape[1]
    D = E // n_head
    mm_dtype = wq_ref.dtype               # weights may already be bf16 (fuse_params)

    x_l = local_ref[0]                    # (tq, E)
    x_g = glob_ref[0]                     # (Tg, E)

    def rmsnorm(x, w):
        # Matches torch RMSNorm: normalize in f32, cast back, then apply weight.
        xf = x.astype(jnp.float32)
        m = jnp.mean(xf * xf, axis=-1, keepdims=True)
        xn = (xf * jax.lax.rsqrt(m + eps)).astype(x.dtype)
        return xn * w                      # (rows, E) * (1, E)

    ln = rmsnorm(x_l, wln_ref[...])        # (tq, E)
    gn = rmsnorm(x_g, wgn_ref[...])        # (Tg, E)

    # Projections.  Softmax scale is already folded into wq; K/V are fused.
    q = jnp.dot(ln.astype(mm_dtype), wq_ref[...],
                preferred_element_type=jnp.float32)          # (tq, E)
    kv = jnp.dot(gn.astype(mm_dtype), wkv_ref[...],
                 preferred_element_type=jnp.float32)         # (Tg, 2E) == [K | V]
    k = kv[:, :E]
    v = kv[:, E:]

    # Head-batched attention: one dot_general per contraction with the head axis
    # as a batch dim (no per-head loop, no explicit k.T).
    qh = q.reshape(tq, n_head, D)
    kh = k.reshape(Tg, n_head, D)
    vh = v.reshape(Tg, n_head, D).astype(mm_dtype)

    s = jnp.einsum("qhd,khd->hqk", qh, kh,
                   preferred_element_type=jnp.float32)        # (H, tq, Tg) f32
    s = s - jnp.max(s, axis=-1, keepdims=True)
    p = jnp.exp(s)
    p = p * pl.reciprocal(jnp.sum(p, axis=-1, keepdims=True), approx=True)
    o = jnp.einsum("hqk,khd->qhd", p.astype(mm_dtype), vh,
                   preferred_element_type=jnp.float32)        # (tq, H, D)
    attn = o.reshape(tq, E)

    # proj -> chunk -> u * silu(g) -> out_proj (gating stays f32 on the VPU/EUP).
    y = jnp.dot(attn.astype(mm_dtype), wp_ref[...],
                preferred_element_type=jnp.float32)           # (tq, 2E)
    u = y[:, :E]
    g = y[:, E:]
    gated = u * (g * jax.nn.sigmoid(g))
    out = jnp.dot(gated.astype(mm_dtype), wo_ref[...],
                  preferred_element_type=jnp.float32)         # (tq, E)
    out_ref[0] = out.astype(out_ref.dtype)


def _const_spec(shape):
    """Constant-index (weight) BlockSpec, single-buffered when supported."""
    idx = lambda b, i: (0,) * len(shape)
    if hasattr(pl, "Buffered"):
        try:
            return pl.BlockSpec(shape, idx, pipeline_mode=pl.Buffered(1))
        except TypeError:       # older jax without pipeline_mode kwarg
            pass
    return pl.BlockSpec(shape, idx)


def _pick_row_tile(t_local, target_rows=512):
    """Largest divisor of Tl that is a multiple of 8 and <= target_rows."""
    if t_local <= target_rows:
        return t_local
    for t in range(target_rows, 7, -1):
        if t_local % t == 0 and t % 8 == 0:
            return t
    return t_local


def fuse_params(params, *, n_head, matmul_dtype=None):
    """One-time parameter fusion: fold softmax scale into Wq, fuse Wk|Wv, and
    optionally pre-cast matmul weights (e.g. bf16) so no in-kernel cast is needed."""
    E = params["wq"].shape[0]
    D = E // n_head
    scale = 1.0 / (D ** 0.5)
    cast = (lambda w: w.astype(matmul_dtype)) if matmul_dtype is not None else (lambda w: w)
    return {
        "w_ln": params["w_ln"],
        "w_gn": params["w_gn"],
        "wq_scaled": cast(params["wq"] * scale),
        "wkv": cast(jnp.concatenate([params["wk"], params["wv"]], axis=1)),  # (E, 2E)
        "wp": cast(params["wp"]),
        "wo": cast(params["wo"]),
    }


def cross_attention_block(local, glob, fused_params, *, n_head, eps=1e-6,
                          row_tile=None, vmem_limit_bytes=None):
    B, Tl, E = local.shape
    Bg, Tg, Eg = glob.shape
    assert Bg == B and Eg == E and E % n_head == 0

    tq = row_tile if row_tile is not None else _pick_row_tile(Tl)
    if Tl % tq != 0 or (tq != Tl and tq % 8 != 0):
        tq = Tl                          # fall back to a full-extent row block
    n_tiles = Tl // tq

    w_ln = fused_params["w_ln"].reshape(1, E)
    w_gn = fused_params["w_gn"].reshape(1, E)
    wq = fused_params["wq_scaled"]
    wkv = fused_params["wkv"]
    wp = fused_params["wp"]
    wo = fused_params["wo"]

    # Explicit VMEM budget: double-buffered activation tiles + single-buffered
    # weights + intermediate slack, clamped to [32 MiB, 64 MiB] (safe on v5e/v6e/v7x).
    if vmem_limit_bytes is None:
        act_item = jnp.dtype(local.dtype).itemsize
        w_item = jnp.dtype(wq.dtype).itemsize
        act_bytes = 2 * (tq * E + Tg * E + tq * E) * act_item
        w_bytes = (2 * E + E * E + 2 * (E * 2 * E) + E * E) * w_item
        interm = 6 * tq * max(E, n_head * Tg) * 4       # f32 intermediates slack
        vmem_limit_bytes = int(min(max(act_bytes + 2 * w_bytes + interm + (8 << 20),
                                       32 << 20), 64 << 20))

    kernel = functools.partial(cross_attn_kernel, n_head=n_head, eps=eps)

    out = pl.pallas_call(
        kernel,
        out_shape=jax.ShapeDtypeStruct((B, Tl, E), local.dtype),
        grid=(B, n_tiles),
        in_specs=[
            pl.BlockSpec((1, tq, E), lambda b, i: (b, i, 0)),   # local row tile
            pl.BlockSpec((1, Tg, E), lambda b, i: (b, 0, 0)),   # global (per batch)
            _const_spec((1, E)),                                # local_norm.weight
            _const_spec((1, E)),                                # global_norm.weight
            _const_spec((E, E)),                                # Wq (pre-scaled)
            _const_spec((E, 2 * E)),                            # Wkv (fused K|V)
            _const_spec((E, 2 * E)),                            # proj
            _const_spec((E, E)),                                # out_proj
        ],
        out_specs=pl.BlockSpec((1, tq, E), lambda b, i: (b, i, 0)),
        compiler_params=pltpu.CompilerParams(
            dimension_semantics=("parallel", "parallel"),
            vmem_limit_bytes=vmem_limit_bytes),
    )(local, glob, w_ln, w_gn, wq, wkv, wp, wo)
    return out


def reference_forward(local, glob, params, *, n_head, eps=1e-6):
    """Plain-JAX reference mirroring the PyTorch forward (use_nvit=False)."""
    E = local.shape[-1]
    D = E // n_head

    def rmsnorm(x, w):
        xf = x.astype(jnp.float32)
        m = jnp.mean(xf * xf, axis=-1, keepdims=True)
        return (xf * jax.lax.rsqrt(m + eps)).astype(x.dtype) * w

    ln = rmsnorm(local, params["w_ln"])
    gn = rmsnorm(glob, params["w_gn"])
    q = ln @ params["wq"]
    k = gn @ params["wk"]
    v = gn @ params["wv"]

    def to_heads(x):
        B, T, _ = x.shape
        return x.reshape(B, T, n_head, D).transpose(0, 2, 1, 3)  # b h t d

    qh, kh, vh = to_heads(q), to_heads(k), to_heads(v)
    s = jnp.einsum("bhtd,bhsd->bhts", qh, kh) / (D ** 0.5)
    p = jax.nn.softmax(s, axis=-1)
    o = jnp.einsum("bhts,bhsd->bhtd", p, vh)
    o = o.transpose(0, 2, 1, 3).reshape(local.shape[0], local.shape[1], E)
    y = o @ params["wp"]
    u, g = y[..., :E], y[..., E:]
    gated = u * (g * jax.nn.sigmoid(g))
    return gated @ params["wo"]


# TODO(synk): use_nvit=True branch (sqk scaling / justnorm residual lerp) is not
# implemented; the module is exercised with its default use_nvit=False config.

if __name__ == "__main__":
    B, Tl, Tg, E, H = 2, 16, 8, 32, 4   # head_dim = 8

    key = jax.random.PRNGKey(0)
    ks = jax.random.split(key, 8)
    scale = 0.05
    params = {
        "w_ln": jnp.ones((E,), jnp.float32),   # RMSNorm init = ones
        "w_gn": jnp.ones((E,), jnp.float32),
        "wq": scale * jax.random.normal(ks[0], (E, E), jnp.float32),
        "wk": scale * jax.random.normal(ks[1], (E, E), jnp.float32),
        "wv": scale * jax.random.normal(ks[2], (E, E), jnp.float32),
        "wp": scale * jax.random.normal(ks[3], (E, 2 * E), jnp.float32),
        "wo": scale * jax.random.normal(ks[4], (E, E), jnp.float32),
    }
    local = jax.random.normal(ks[5], (B, Tl, E), jnp.float32)
    glob = jax.random.normal(ks[6], (B, Tg, E), jnp.float32)

    # f32 weights for the correctness check; pass matmul_dtype=jnp.bfloat16 for
    # production-size E to halve weight DMA/VMEM.
    fused = fuse_params(params, n_head=H)
    fwd = jax.jit(functools.partial(cross_attention_block, n_head=H))
    out = jax.block_until_ready(fwd(local, glob, fused))

    ref = reference_forward(local, glob, params, n_head=H)
    assert out.shape == (B, Tl, E)
    # approx reciprocal (EUP) in softmax -> slightly looser tolerance than exact f32
    assert jnp.allclose(out, ref, rtol=5e-3, atol=2e-5), "mismatch vs reference"

    print("KERNEL_OK")
</pallas_src>

<mosaic_0001>
module attributes {stable_mosaic.version = 11 : i64} {
  func.func @cross_attn_kernel(%arg0: i32, %arg1: i32, %arg2: memref<1x16x32xf32, #tpu.memory_space<vmem>>, %arg3: memref<1x8x32xf32, #tpu.memory_space<vmem>>, %arg4: memref<1x32xf32, #tpu.memory_space<vmem>>, %arg5: memref<1x32xf32, #tpu.memory_space<vmem>>, %arg6: memref<32x32xf32, #tpu.memory_space<vmem>>, %arg7: memref<32x64xf32, #tpu.memory_space<vmem>>, %arg8: memref<32x64xf32, #tpu.memory_space<vmem>>, %arg9: memref<32x32xf32, #tpu.memory_space<vmem>>, %arg10: memref<1x16x32xf32, #tpu.memory_space<vmem>>) attributes {dimension_semantics = [#tpu.dimension_semantics<parallel>, #tpu.dimension_semantics<parallel>], iteration_bounds = array<i64: 2, 1>, scalar_prefetch = 0 : i64, scratch_operands = 0 : i64, tpu.core_type = #tpu.core_type<tc>, window_params = [{transform_indices = @transform_0, window_bounds = array<i64: 1, 16, 32>}, {transform_indices = @transform_1, window_bounds = array<i64: 1, 8, 32>}, {pipeline_mode = #tpu.pipeline_mode<synchronous>, transform_indices = @transform_2, window_bounds = array<i64: 1, 32>}, {pipeline_mode = #tpu.pipeline_mode<synchronous>, transform_indices = @transform_3, window_bounds = array<i64: 1, 32>}, {pipeline_mode = #tpu.pipeline_mode<synchronous>, transform_indices = @transform_4, window_bounds = array<i64: 32, 32>}, {pipeline_mode = #tpu.pipeline_mode<synchronous>, transform_indices = @transform_5, window_bounds = array<i64: 32, 64>}, {pipeline_mode = #tpu.pipeline_mode<synchronous>, transform_indices = @transform_6, window_bounds = array<i64: 32, 64>}, {pipeline_mode = #tpu.pipeline_mode<synchronous>, transform_indices = @transform_7, window_bounds = array<i64: 32, 32>}, {transform_indices = @transform_8, window_bounds = array<i64: 1, 16, 32>}]} {
    %c0 = arith.constant 0 : index
    %c0_0 = arith.constant 0 : index
    %c0_1 = arith.constant 0 : index
    %0 = vector.load %arg2[%c0, %c0_0, %c0_1] : memref<1x16x32xf32, #tpu.memory_space<vmem>>, vector<1x16x32xf32>
    %1 = vector.shape_cast %0 : vector<1x16x32xf32> to vector<16x32xf32>
    %c0_2 = arith.constant 0 : index
    %c0_3 = arith.constant 0 : index
    %c0_4 = arith.constant 0 : index
    %2 = vector.load %arg3[%c0_2, %c0_3, %c0_4] : memref<1x8x32xf32, #tpu.memory_space<vmem>>, vector<1x8x32xf32>
    %3 = vector.shape_cast %2 : vector<1x8x32xf32> to vector<8x32xf32>
    %c0_5 = arith.constant 0 : index
    %c0_6 = arith.constant 0 : index
    %4 = vector.load %arg4[%c0_5, %c0_6] : memref<1x32xf32, #tpu.memory_space<vmem>>, vector<1x32xf32>
    %5 = arith.mulf %1, %1 : vector<16x32xf32>
    %cst = arith.constant dense<0.000000e+00> : vector<16xf32>
    %6 = vector.multi_reduction <add>, %5, %cst [1] : vector<16x32xf32> to vector<16xf32>
    %7 = vector.shape_cast %6 : vector<16xf32> to vector<16x1xf32>
    %cst_7 = arith.constant 3.200000e+01 : f32
    %8 = vector.broadcast %cst_7 : f32 to vector<16x1xf32>
    %9 = arith.divf %7, %8 : vector<16x1xf32>
    %cst_8 = arith.constant 9.99999997E-7 : f32
    %10 = vector.broadcast %cst_8 : f32 to vector<16x1xf32>
    %11 = arith.addf %9, %10 : vector<16x1xf32>
    %12 = math.rsqrt %11 : vector<16x1xf32>
    %13 = vector.broadcast %12 : vector<16x1xf32> to vector<16x32xf32>
    %14 = arith.mulf %1, %13 : vector<16x32xf32>
    %15 = vector.broadcast %4 : vector<1x32xf32> to vector<16x32xf32>
    %16 = arith.mulf %14, %15 : vector<16x32xf32>
    %c0_9 = arith.constant 0 : index
    %c0_10 = arith.constant 0 : index
    %17 = vector.load %arg5[%c0_9, %c0_10] : memref<1x32xf32, #tpu.memory_space<vmem>>, vector<1x32xf32>
    %18 = arith.mulf %3, %3 : vector<8x32xf32>
    %cst_11 = arith.constant dense<0.000000e+00> : vector<8xf32>
    %19 = vector.multi_reduction <add>, %18, %cst_11 [1] : vector<8x32xf32> to vector<8xf32>
    %20 = vector.shape_cast %19 : vector<8xf32> to vector<8x1xf32>
    %cst_12 = arith.constant 3.200000e+01 : f32
    %21 = vector.broadcast %cst_12 : f32 to vector<8x1xf32>
    %22 = arith.divf %20, %21 : vector<8x1xf32>
    %cst_13 = arith.constant 9.99999997E-7 : f32
    %23 = vector.broadcast %cst_13 : f32 to vector<8x1xf32>
    %24 = arith.addf %22, %23 : vector<8x1xf32>
    %25 = math.rsqrt %24 : vector<8x1xf32>
    %26 = vector.broadcast %25 : vector<8x1xf32> to vector<8x32xf32>
    %27 = arith.mulf %3, %26 : vector<8x32xf32>
    %28 = vector.broadcast %17 : vector<1x32xf32> to vector<8x32xf32>
    %29 = arith.mulf %27, %28 : vector<8x32xf32>
    %c0_14 = arith.constant 0 : index
    %c0_15 = arith.constant 0 : index
    %30 = vector.load %arg6[%c0_14, %c0_15] : memref<32x32xf32, #tpu.memory_space<vmem>>, vector<32x32xf32>
    %cst_16 = arith.constant dense<0.000000e+00> : vector<16x32xf32>
    %31 = tpu.matmul %16, %30, %cst_16 {dimension_numbers = #tpu.dot_dimension_numbers<[1], [0], [0], [1], [0, 0, 1, 1], [], []>} : vector<16x32xf32>, vector<32x32xf32>, vector<16x32xf32> -> vector<16x32xf32>
    %c0_17 = arith.constant 0 : index
    %c0_18 = arith.constant 0 : index
    %32 = vector.load %arg7[%c0_17, %c0_18] : memref<32x64xf32, #tpu.memory_space<vmem>>, vector<32x64xf32>
    %cst_19 = arith.constant dense<0.000000e+00> : vector<8x64xf32>
    %33 = tpu.matmul %29, %32, %cst_19 {dimension_numbers = #tpu.dot_dimension_numbers<[1], [0], [0], [1], [0, 0, 1, 1], [], []>} : vector<8x32xf32>, vector<32x64xf32>, vector<8x64xf32> -> vector<8x64xf32>
    %34 = vector.extract_strided_slice %33 {offsets = [0, 0], sizes = [8, 32], strides = [1, 1]} : vector<8x64xf32> to vector<8x32xf32>
    %35 = vector.extract_strided_slice %33 {offsets = [0, 32], sizes = [8, 32], strides = [1, 1]} : vector<8x64xf32> to vector<8x32xf32>
    %36 = vector.shape_cast %31 : vector<16x32xf32> to vector<16x4x8xf32>
    %37 = vector.shape_cast %34 : vector<8x32xf32> to vector<8x4x8xf32>
    %38 = vector.shape_cast %35 : vector<8x32xf32> to vector<8x4x8xf32>
    "tpu.trace_start"() <{level = 10 : i32, message = "qhd,khd->hqk"}> : () -> ()
    %cst_20 = arith.constant dense<0.000000e+00> : vector<4x16x8xf32>
    %39 = tpu.matmul %36, %37, %cst_20 {dimension_numbers = #tpu.dot_dimension_numbers<[2], [2], [0], [0], [0, 1, 0, 0, 1, 0], [1], [1]>} : vector<16x4x8xf32>, vector<8x4x8xf32>, vector<4x16x8xf32> -> vector<4x16x8xf32>
    "tpu.trace_stop"() : () -> ()
    %cst_21 = arith.constant dense<0xFF800000> : vector<4x16xf32>
    %40 = vector.multi_reduction <maximumf>, %39, %cst_21 [2] : vector<4x16x8xf32> to vector<4x16xf32>
    %41 = vector.shape_cast %40 : vector<4x16xf32> to vector<4x16x1xf32>
    %42 = vector.broadcast %41 : vector<4x16x1xf32> to vector<4x16x8xf32>
    %43 = arith.subf %39, %42 : vector<4x16x8xf32>
    %44 = math.exp %43 : vector<4x16x8xf32>
    %cst_22 = arith.constant dense<0.000000e+00> : vector<4x16xf32>
    %45 = vector.multi_reduction <add>, %44, %cst_22 [2] : vector<4x16x8xf32> to vector<4x16xf32>
    %46 = vector.shape_cast %45 : vector<4x16xf32> to vector<4x16x1xf32>
    %47 = tpu.reciprocal %46 {approx = true} : vector<4x16x1xf32> -> vector<4x16x1xf32>
    %48 = vector.broadcast %47 : vector<4x16x1xf32> to vector<4x16x8xf32>
    %49 = arith.mulf %44, %48 : vector<4x16x8xf32>
    "tpu.trace_start"() <{level = 10 : i32, message = "hqk,khd->qhd"}> : () -> ()
    %cst_23 = arith.constant dense<0.000000e+00> : vector<4x8x16xf32>
    %50 = tpu.matmul %38, %49, %cst_23 {dimension_numbers = #tpu.dot_dimension_numbers<[0], [2], [2], [1], [0, 1, 0, 2, 1, 1], [1], [0]>} : vector<8x4x8xf32>, vector<4x16x8xf32>, vector<4x8x16xf32> -> vector<4x8x16xf32>
    %51 = tpu.transpose %50, [2, 0, 1] : vector<4x8x16xf32> -> vector<16x4x8xf32>
    "tpu.trace_stop"() : () -> ()
    %52 = vector.shape_cast %51 : vector<16x4x8xf32> to vector<16x32xf32>
    %c0_24 = arith.constant 0 : index
    %c0_25 = arith.constant 0 : index
    %53 = vector.load %arg8[%c0_24, %c0_25] : memref<32x64xf32, #tpu.memory_space<vmem>>, vector<32x64xf32>
    %cst_26 = arith.constant dense<0.000000e+00> : vector<16x64xf32>
    %54 = tpu.matmul %52, %53, %cst_26 {dimension_numbers = #tpu.dot_dimension_numbers<[1], [0], [0], [1], [0, 0, 1, 1], [], []>} : vector<16x32xf32>, vector<32x64xf32>, vector<16x64xf32> -> vector<16x64xf32>
    %55 = vector.extract_strided_slice %54 {offsets = [0, 0], sizes = [16, 32], strides = [1, 1]} : vector<16x64xf32> to vector<16x32xf32>
    %56 = vector.extract_strided_slice %54 {offsets = [0, 32], sizes = [16, 32], strides = [1, 1]} : vector<16x64xf32> to vector<16x32xf32>
    %57 = arith.negf %56 : vector<16x32xf32>
    %58 = math.exp %57 : vector<16x32xf32>
    %cst_27 = arith.constant 1.000000e+00 : f32
    %59 = vector.broadcast %cst_27 : f32 to vector<16x32xf32>
    %60 = arith.addf %59, %58 : vector<16x32xf32>
    %61 = arith.divf %59, %60 : vector<16x32xf32>
    %62 = arith.mulf %56, %61 : vector<16x32xf32>
    %63 = arith.mulf %55, %62 : vector<16x32xf32>
    %c0_28 = arith.constant 0 : index
    %c0_29 = arith.constant 0 : index
    %64 = vector.load %arg9[%c0_28, %c0_29] : memref<32x32xf32, #tpu.memory_space<vmem>>, vector<32x32xf32>
    %cst_30 = arith.constant dense<0.000000e+00> : vector<16x32xf32>
    %65 = tpu.matmul %63, %64, %cst_30 {dimension_numbers = #tpu.dot_dimension_numbers<[1], [0], [0], [1], [0, 0, 1, 1], [], []>} : vector<16x32xf32>, vector<32x32xf32>, vector<16x32xf32> -> vector<16x32xf32>
    %c0_31 = arith.constant 0 : index
    %c0_32 = arith.constant 0 : index
    %c0_33 = arith.constant 0 : index
    %66 = vector.load %arg10[%c0_31, %c0_32, %c0_33] : memref<1x16x32xf32, #tpu.memory_space<vmem>>, vector<1x16x32xf32>
    %67 = vector.shape_cast %66 : vector<1x16x32xf32> to vector<16x32xf32>
    %68 = vector.shape_cast %65 : vector<16x32xf32> to vector<1x16x32xf32>
    tpu.vector_store %arg10[%c0_31, %c0_32, %c0_33], %68 {strides = array<i32>} : memref<1x16x32xf32, #tpu.memory_space<vmem>>, vector<1x16x32xf32>,
    return
  }
  func.func @transform_0(%arg0: i32, %arg1: i32) -> (i32, i32, i32) {
    %c0_i32 = arith.constant 0 : i32
    %c0_i32_0 = arith.constant 0 : i32
    return %arg0, %arg1, %c0_i32 : i32, i32, i32
  }
  func.func @transform_1(%arg0: i32, %arg1: i32) -> (i32, i32, i32) {
    %c0_i32 = arith.constant 0 : i32
    %c0_i32_0 = arith.constant 0 : i32
    %c0_i32_1 = arith.constant 0 : i32
    return %arg0, %c0_i32, %c0_i32_0 : i32, i32, i32
  }
  func.func @transform_2(%arg0: i32, %arg1: i32) -> (i32, i32) {
    %c0_i32 = arith.constant 0 : i32
    %c0_i32_0 = arith.constant 0 : i32
    %c0_i32_1 = arith.constant 0 : i32
    return %c0_i32, %c0_i32_0 : i32, i32
  }
  func.func @transform_3(%arg0: i32, %arg1: i32) -> (i32, i32) {
    %c0_i32 = arith.constant 0 : i32
    %c0_i32_0 = arith.constant 0 : i32
    %c0_i32_1 = arith.constant 0 : i32
    return %c0_i32, %c0_i32_0 : i32, i32
  }
  func.func @transform_4(%arg0: i32, %arg1: i32) -> (i32, i32) {
    %c0_i32 = arith.constant 0 : i32
    %c0_i32_0 = arith.constant 0 : i32
    %c0_i32_1 = arith.constant 0 : i32
    return %c0_i32, %c0_i32_0 : i32, i32
  }
  func.func @transform_5(%arg0: i32, %arg1: i32) -> (i32, i32) {
    %c0_i32 = arith.constant 0 : i32
    %c0_i32_0 = arith.constant 0 : i32
    %c0_i32_1 = arith.constant 0 : i32
    return %c0_i32, %c0_i32_0 : i32, i32
  }
  func.func @transform_6(%arg0: i32, %arg1: i32) -> (i32, i32) {
    %c0_i32 = arith.constant 0 : i32
    %c0_i32_0 = arith.constant 0 : i32
    %c0_i32_1 = arith.constant 0 : i32
    return %c0_i32, %c0_i32_0 : i32, i32
  }
  func.func @transform_7(%arg0: i32, %arg1: i32) -> (i32, i32) {
    %c0_i32 = arith.constant 0 : i32
    %c0_i32_0 = arith.constant 0 : i32
    %c0_i32_1 = arith.constant 0 : i32
    return %c0_i32, %c0_i32_0 : i32, i32
  }
  func.func @transform_8(%arg0: i32, %arg1: i32) -> (i32, i32, i32) {
    %c0_i32 = arith.constant 0 : i32
    %c0_i32_0 = arith.constant 0 : i32
    return %arg0, %arg1, %c0_i32 : i32, i32, i32
  }
}

</mosaic_0001>

<bundles_post_ra>
// kernel: cross_attention_block.1
= control target key start
LH: loop header
LB: loop body
LE: loop exit
PB: predicated region body
PF: predicated region fallthrough
CT: control target
= control target key end

     0   :  { %s3602_s0 = inlined_call_operand.hbm [shape: f32[2,16,32], index: 0, kind: input, shape index: {}]   ;;  %s3603_s1 = inlined_call_operand.hbm [shape: f32[2,8,32], index: 1, kind: input, shape index: {}]   ;;  %s3604_s2 = inlined_call_operand.vmem [shape: f32[1,32], index: 2, kind: input, shape index: {}]   ;;  %s3605_s3 = inlined_call_operand.vmem [shape: f32[1,32], index: 3, kind: input, shape index: {}]   ;;  %s3606_s4 = inlined_call_operand.vmem [shape: f32[32,32], index: 4, kind: input, shape index: {}]   ;;  %s3607_s5 = inlined_call_operand.hbm [shape: f32[32,64], index: 5, kind: input, shape index: {}]   ;;  %s3608_s6 = inlined_call_operand.hbm [shape: f32[32,64], index: 6, kind: input, shape index: {}]   ;;  %s3609_s7 = inlined_call_operand.hbm [shape: f32[32,32], index: 7, kind: input, shape index: {}]   ;;  %s3610_s8 = inlined_call_operand.hbm [shape: f32[2,16,32], index: 8, kind: output, shape index: {}]  }
   0x1   :  { %3620 = sst [smem:[#allocation20_spill]] %s3602_s0 }
   0x2   :  { %3621 = sst [smem:[#allocation21_spill]] %s3607_s5 }
   0x3   :  { %3622 = sst [smem:[#allocation22_spill]] %s3608_s6 }
   0x4   :  { %3623 = sst [smem:[#allocation23_spill]] %s3609_s7 }
   0x5   :  { %3624 = sst [smem:[#allocation24_spill]] %s3610_s8 }
   0x6   :  { %13 = vsyncpa [#allocation3], 0 }
   0x7   :  { %15 = vsyncpa [#allocation3 + $0x1], 0 }
   0x8   :  { %16 = vsyncpa [#allocation6], 0 }
   0x9   :  { %18 = vsyncpa [#allocation6 + $0x1], 0 }
   0xa   :  { %19 = vsyncpa [#allocation9], 0 }
   0xb   :  { %20 = vsyncpa [#allocation4], 0 }
   0xc   :  { %22 = vsyncpa [#allocation4 + $0x1], 0  ;;  %s3138_s27 = smov 0   ;;  %s3140_s28 = smov 0  }
   0xd   :  { %s3142_s29 = smov 0   ;;  %s3144_s30 = smov 0  }
   0xe   :  { %s3146_s9 = smov 0   ;;  %s3148_s10 = smov 0  }
   0xf LB: > { %3625 = sst [smem:[#allocation17_spill]] %s3050_s27  ;;  %s3169_s11 = sadd.s32 4294967295, %s3070_s10   ;;  %s3070_s10 = sphi %s3148_s10, %s28_s10   ;;  %s3066_s9 = sphi %s3146_s9, %s3662_s9   ;;  %s3062_s30 = sphi %s3144_s30, %s3661_s30   ;;  %s3058_s29 = sphi %s3142_s29, %s3660_s29   ;;  %s3054_s28 = sphi %s3140_s28, %s3659_s28   ;;  %s3050_s27 = sphi %s3138_s27, %s3658_s27  }
  0x10   : > { %3626 = sst [smem:[#allocation18_spill]] %s3062_s30  ;;  %s2428_s12 = sadd.s32 4294967294, %s3070_s10  }
  0x11   : > { %p62_p0 = scmp.ne.s32.totalorder %s3054_s28, %s3050_s27  ;;  %p3611_p1 = scmp.eq.s32.totalorder %s3169_s11, 0 }
  0x12   : > { %p246_p3 = scmp.eq.s32.totalorder %s2428_s12, 1  ;;  %p2429_p5 = scmp.ge.s32.totalorder %s3070_s10, 1 }
  0x13   : > { %p3178_p4 = por %p3611_p1, %p62_p0  ;;  %p253_p7 = scmp.lt.s32.totalorder %s3070_s10, 3 }
  0x14   : > { %p3183_p6 = por %p246_p3, %p62_p0  ;;  %s3072_s16 = smov [#allocation7]  }
  0x15   : > { %s3627_s13 = scalar_select %p3178_p4, 1, 0 }
  0x16   : > { %s3628_s14 = scalar_select %p3183_p6, 1, 0 }
  0x17   : > { %p3188_p8 = pnand %p2429_p5, %p253_p7  ;;  %s274_s17 = sshll.u32 %s3072_s16, 4  ;;  %s3192_s17 = int_to_ptr.vmem [resolvable:$true] %s274_s17 }
  0x18   : > { %3629 = sst [smem:[#allocation19_spill]] %s3628_s14  ;;  %s3073_s19 = smov [#allocation8]  }
  0x19   : > { %s3630_s15 = scalar_select %p3188_p8, 1, 0 }
  0x1a   : > { %p2691_p9 = pneg %p3188_p8  ;;  %s287_s20 = sshll.u32 %s3073_s19, 4  ;;  %s3203_s20 = int_to_ptr.vmem [resolvable:$true] %s287_s20 }
  0x1b   : > { %s3074_s21 = smov [#allocation10]   ;;  %s3632_s5 = sld [smem:[#allocation21_spill]] }
  0x1c   : > { %p3199_p11 = pnand %p2691_p9, %p3611_p1  ;;  %s3205_s22 = sshll.u32 %s3074_s21, 4  ;;  %s301_s22 = int_to_ptr.vmem [resolvable:$true] %s3205_s22 }
  0x1e   : > { %p3215_p13 = pneg %p3199_p11 }
  0x21   : > { %s2832_s25 = scalar_lea.hbm %s3632_s5, 512 }
  0x22   : > { %p2833_p12 = scmp.ne.s32.totalorder %s3632_s5, %s2832_s25  ;;  %p2839_p5 = scmp.lt.u32.totalorder %s2832_s25, %s3632_s5 }
  0x24   : > { %p2835_p0 = pnand %p3215_p13, %p2833_p12 }
  0x26   : > { %p2836_p3 = pneg %p2835_p0 }
  0x28   : > { %p2841_p7 = pnand %p2839_p5, %p2836_p3 }
  0x2a   : > { %2844 = shalt.err (!%p2841_p7)
}
  0x2b   : > { %s2845_s23 = scalar_lea.vmem %s3192_s17, 512  ;;  %p2853_p2 = scmp.lt.s32.totalorder %s3192_s17, %s3192_s17 }
  0x2c   : > { %p2846_p9 = scmp.ne.s32.totalorder %s3192_s17, %s2845_s23  ;;  %p2854_p6 = scmp.lt.s32.totalorder %s2845_s23, %s2845_s23 }
  0x2e   : > { %p2848_p10 = pnand %p2846_p9, %p3215_p13  ;;  %p2855_p12 = por %p2854_p6, %p2853_p2 }
  0x30   : > { %p2849_p1 = pneg %p2848_p10 }
  0x32   : > { %p2856_p0 = pnand %p2855_p12, %p2849_p1 }
  0x34   : > { %2859 = shalt.err (!%p2856_p0)
}
  0x35   : > { %s3617_s24 = smov 128   ;;  %s3618_s25 = smov 8  }
  0x36   : > { %2694 = dma.hbm_to_vmem [thread:$0]  (!%p3199_p11), %s3632_s5, 512, %s3192_s17, [#allocation6], %s3617_s24, %s3617_s24, %s3618_s25  }
  0x37   : > { %s3634_s6 = sld [smem:[#allocation22_spill]] }
  0x3d   : > { %s2860_s23 = scalar_lea.hbm %s3634_s6, 512 }
  0x3e   : > { %p2861_p1 = scmp.ne.s32.totalorder %s3634_s6, %s2860_s23  ;;  %p2867_p10 = scmp.lt.u32.totalorder %s2860_s23, %s3634_s6 }
  0x40   : > { %p2863_p2 = pnand %p2861_p1, %p3215_p13 }
  0x42   : > { %p2864_p6 = pneg %p2863_p2 }
  0x44   : > { %p2869_p3 = pnand %p2867_p10, %p2864_p6 }
  0x46   : > { %2872 = shalt.err (!%p2869_p3)
}
  0x47   : > { %s2873_s17 = scalar_lea.vmem %s3203_s20, 512  ;;  %p2881_p12 = scmp.lt.s32.totalorder %s3203_s20, %s3203_s20 }
  0x48   : > { %p2874_p5 = scmp.ne.s32.totalorder %s3203_s20, %s2873_s17  ;;  %p2882_p0 = scmp.lt.s32.totalorder %s2873_s17, %s2873_s17 }
  0x4a   : > { %p2876_p7 = pnand %p2874_p5, %p3215_p13  ;;  %p2883_p1 = por %p2882_p0, %p2881_p12 }
  0x4c   : > { %p2877_p9 = pneg %p2876_p7 }
  0x4e   : > { %p2884_p2 = pnand %p2883_p1, %p2877_p9 }
  0x50   : > { %2887 = shalt.err (!%p2884_p2)
}
  0x51   : > { %2697 = dma.hbm_to_vmem [thread:$0]  (!%p3199_p11), %s3634_s6, 512, %s3203_s20, [#allocation9], %s3617_s24, %s3617_s24, %s3618_s25  }
  0x52   : > { %s3635_s7 = sld [smem:[#allocation23_spill]] }
  0x58   : > { %s2888_s26 = scalar_lea.hbm %s3635_s7, 512 }
  0x59   : > { %p2889_p6 = scmp.ne.s32.totalorder %s3635_s7, %s2888_s26  ;;  %p2895_p5 = scmp.lt.u32.totalorder %s2888_s26, %s3635_s7 }
  0x5b   : > { %p2891_p10 = pnand %p2889_p6, %p3215_p13 }
  0x5d   : > { %p2892_p3 = pneg %p2891_p10 }
  0x5f   : > { %p2897_p7 = pnand %p2895_p5, %p2892_p3 }
  0x61   : > { %2900 = shalt.err (!%p2897_p7)
}
  0x62   : > { %s2901_s17 = scalar_lea.vmem %s301_s22, 512  ;;  %p2909_p1 = scmp.lt.s32.totalorder %s301_s22, %s301_s22 }
  0x63   : > { %p2902_p9 = scmp.ne.s32.totalorder %s301_s22, %s2901_s17  ;;  %p2910_p2 = scmp.lt.s32.totalorder %s2901_s17, %s2901_s17 }
  0x65   : > { %p2904_p12 = pnand %p2902_p9, %p3215_p13  ;;  %p2911_p4 = por %p2910_p2, %p2909_p1 }
  0x67   : > { %p2905_p0 = pneg %p2904_p12 }
  0x69   : > { %p2912_p8 = pnand %p2911_p4, %p2905_p0 }
  0x6b   : > { %2915 = shalt.err (!%p2912_p8)
}
  0x6c   : > { %2700 = dma.hbm_to_vmem [thread:$0]  (!%p3199_p11), %s3635_s7, 512, %s301_s22, [#allocation9], %s3617_s24, %s3617_s24, %s3618_s25  }
  0x6d   : > { %s49_s16 = sadd.s32 1, %s3058_s29  ;;  %s40_s18 = sadd.s32 1, %s3066_s9 }
  0x6e   : > { %p56_p4 = scmp.ne.s32.totalorder %s3058_s29, %s3054_s28  ;;  %p42_p8 = scmp.ge.s32.totalorder %s40_s18, 2 }
  0x6f   : > { %p57_p13 = scmp.eq.s32.totalorder %s3070_s10, 0  ;;  %p3636_p6 = scmp.eq.s32.totalorder %s3169_s11, 1 }
  0x70   : > { %p2715_p3 = scmp.lt.s32.totalorder %s3070_s10, 2  ;;  %s3664_s18 = smov (%p42_p8, %s40_s18), 0 }
  0x71   : > { %p3294_p10 = por %p3636_p6, %p56_p4  ;;  %p58_p5 = por %p57_p13, %p56_p4 }
  0x72   : > { %s3302_s30 = sand.u32 1, %s3058_s29   ;;  %s44_s22 = ssub.s32 %s3066_s9, %s3664_s18 }
  0x73   : > { %s3637_s27 = scalar_select %p3294_p10, 1, 0 }
  0x74   : > { %p47_p11 = scmp.eq.s32.totalorder %s44_s22, 0  ;;  %s2434_s14 = sshll.u32 %s3302_s30, 4 }
  0x75   : > { %s2486_s26 = sshll.u32 %s3066_s9, 8  ;;  %s3638_s0 = sld [smem:[#allocation20_spill]] }
  0x76   : > { %s3309_s12 = scalar_select %p47_p11, %s3058_s29, %s49_s16  }
  0x77   : > { %s318_s17 = scalar_lea.vmem [#allocation2], %s2434_s14  ;;  %p3320_p7 = pnand %p2715_p3, %p58_p5 }
  0x78   : > { %s327_s20 = sshll.u32 %s318_s17, 4  ;;  %s2437_s22 = sshll.u32 %s3302_s30, 3  ;;  %s3316_s20 = int_to_ptr.vmem [resolvable:$true] %s327_s20 }
  0x79   : > { %s315_s19 = scalar_lea.sflag [#allocation3], %s3302_s30  ;;  %p2918_p12 = pneg %p3320_p7 }
  0x7b   : > { %s3314_s23 = scalar_lea.hbm %s3638_s0, %s2486_s26  ;;  %s2921_s17 = scalar_lea.hbm %s3638_s0, 512 }
  0x7c   : > { %s2916_s26 = scalar_lea.hbm %s3314_s23, 256  ;;  %p2922_p2 = scmp.lt.u32.totalorder %s3314_s23, %s3638_s0 }
  0x7d   : > { %p2917_p9 = scmp.ne.s32.totalorder %s3314_s23, %s2916_s26  ;;  %p2923_p4 = scmp.lt.u32.totalorder %s2921_s17, %s2916_s26 }
  0x7e   : > { %p2925_p13 = scmp.lt.u32.totalorder %s2916_s26, %s3314_s23 }
  0x7f   : > { %p2919_p0 = pnand %p2918_p12, %p2917_p9  ;;  %p2924_p8 = por %p2923_p4, %p2922_p2 }
  0x81   : > { %p2920_p1 = pneg %p2919_p0  ;;  %p2926_p6 = por %p2925_p13, %p2924_p8 }
  0x83   : > { %p2927_p3 = pnand %p2926_p6, %p2920_p1 }
  0x85   : > { %2930 = shalt.err (!%p2927_p3)
}
  0x86   : > { %s2931_s16 = scalar_lea.vmem %s3316_s20, 256  ;;  %s3077_s14 = smov [#allocation2]  }
  0x87   : > { %p2932_p5 = scmp.ne.s32.totalorder %s3316_s20, %s2931_s16  ;;  %s2936_s21 = sshll.u32 %s3077_s14, 4  ;;  %s2937_s21 = int_to_ptr.vmem [resolvable:$false] %s2936_s21 }
  0x88   : > { %s2938_s24 = scalar_lea.vmem %s2937_s21, 512  ;;  %p2939_p0 = scmp.lt.s32.totalorder %s3316_s20, %s2937_s21 }
  0x89   : > { %p2934_p11 = pnand %p2932_p5, %p2918_p12  ;;  %p2940_p2 = scmp.lt.s32.totalorder %s2938_s24, %s2931_s16 }
  0x8b   : > { %p2935_p9 = pneg %p2934_p11  ;;  %p2941_p4 = por %p2940_p2, %p2939_p0 }
  0x8d   : > { %p2942_p8 = pnand %p2941_p4, %p2935_p9 }
  0x8f   : > { %2945 = shalt.err (!%p2942_p8)
}
  0x90   : > { %s3640_s25 = smov 8   ;;  %s3641_s26 = smov 128  }
  0x91   : > { %2704 = dma.hbm_to_vmem [thread:$0]  (!%p3320_p7), %s3314_s23, 256, %s3316_s20, %s315_s19, %s3641_s26, %s3641_s26, %s3640_s25  }
  0x92   : > { %s2438_s17 = sshll.u32 %s3066_s9, 7  ;;  %s341_s24 = scalar_lea.vmem [#allocation5], %s2437_s22 }
  0x93   : > { %s3361_s21 = scalar_lea.hbm %s3603_s1, %s2438_s17  ;;  %s348_s0 = sshll.u32 %s341_s24, 4  ;;  %s349_s0 = int_to_ptr.vmem [resolvable:$true] %s348_s0 }
  0x94   : > { %s3642_s5 = sand.u32 1, %s3070_s10   ;;  %s2946_s7 = scalar_lea.hbm %s3361_s21, 128 }
  0x95   : > { %s338_s6 = scalar_lea.sflag [#allocation6], %s3642_s5  ;;  %p2947_p1 = scmp.ne.s32.totalorder %s3361_s21, %s2946_s7 }
  0x96   : > { %s2951_s19 = scalar_lea.hbm %s3603_s1, 256  ;;  %p2952_p3 = scmp.lt.u32.totalorder %s3361_s21, %s3603_s1 }
  0x97   : > { %p2949_p13 = pnand %p2947_p1, %p2918_p12  ;;  %p2953_p5 = scmp.lt.u32.totalorder %s2951_s19, %s2946_s7 }
  0x98   : > { %p2955_p9 = scmp.lt.u32.totalorder %s2946_s7, %s3361_s21 }
  0x99   : > { %p2950_p6 = pneg %p2949_p13  ;;  %p2954_p11 = por %p2953_p5, %p2952_p3 }
  0x9b   : > { %p2956_p0 = por %p2955_p9, %p2954_p11 }
  0x9d   : > { %p2957_p2 = pnand %p2956_p0, %p2950_p6 }
  0x9f   : > { %2960 = shalt.err (!%p2957_p2)
}
  0xa0   : > { %s2961_s5 = scalar_lea.vmem %s349_s0, 128  ;;  %s3078_s22 = smov [#allocation5]  }
  0xa1   : > { %p2962_p4 = scmp.ne.s32.totalorder %s349_s0, %s2961_s5  ;;  %s2966_s26 = sshll.u32 %s3078_s22, 4  ;;  %s2967_s26 = int_to_ptr.vmem [resolvable:$false] %s2966_s26 }
  0xa2   : > { %s2968_s17 = scalar_lea.vmem %s2967_s26, 256  ;;  %p2969_p13 = scmp.lt.s32.totalorder %s349_s0, %s2967_s26 }
  0xa3   : > { %p2964_p8 = pnand %p2962_p4, %p2918_p12  ;;  %p2970_p10 = scmp.lt.s32.totalorder %s2968_s17, %s2961_s5 }
  0xa5   : > { %p2965_p1 = pneg %p2964_p8  ;;  %p2971_p3 = por %p2970_p10, %p2969_p13 }
  0xa7   : > { %p2972_p5 = pnand %p2971_p3, %p2965_p1 }
  0xa9   : > { %2975 = shalt.err (!%p2972_p5)
}
  0xaa   : > { %2707 = dma.hbm_to_vmem [thread:$0]  (!%p3320_p7), %s3361_s21, 128, %s349_s0, %s338_s6  }
  0xab   : > { %p3643_p6 = scmp.ne.s32.totalorder %s3630_s15, 0 }
  0xac   : > { %s3389_s7 = sand.u32 (!%p3643_p6), 1, %s3054_s28   ;;  %p3644_p10 = scmp.ne.s32.totalorder (!%p3643_p6), %s3627_s13, 0 }
  0xad   : > { %357 = sbr.rel (%p3643_p6) target bundleno = 2553 (0x9f9), region = 52  ;;  %s2440_s14 = sshll.u32 (!%p3643_p6), %s3389_s7, 4 }
  0xae   : > { %s360_s16 = scalar_lea.sflag (!%p3643_p6), [#allocation3], %s3389_s7  ;;  %s363_s24 = scalar_lea.vmem (!%p3643_p6), [#allocation2], %s2440_s14 }
  0xb4   : > { %3029 = dma.done.wait (%p3644_p10), %s360_s16, 256  }
  0xb5   : > { %3031 = vsyncadd (%p3644_p10), %s360_s16, 4294967040  ;;  %s368_s0 = sand.u32 1, %s3169_s11   ;;  %s2441_s6 = sshll.u32 %s3389_s7, 3 }
  0xb6   : > { %s369_s15 = scalar_lea.sflag [#allocation6], %s368_s0  ;;  %s372_s8 = scalar_lea.vmem [#allocation5], %s2441_s6 }
  0xb7   : > { %3033 = dma.done.wait (%p3644_p10), %s369_s15, 128  }
  0xb8   : > { %3035 = vsyncadd (%p3644_p10), %s369_s15, 4294967168  ;;  %p3645_p7 = scmp.eq.s32.totalorder %s3169_s11, 0 }
  0xba   : > { %3037 = dma.done.wait (%p3645_p7), [#allocation6], 512   ;;  %p3646_p12 = pmov %p3645_p7 }
  0xbb   : > { %p3647_p11 = pmov %p3645_p7 }
  0xbc   : > { %3039 = vsyncadd (%p3646_p12), [#allocation6], 4294966784 }
  0xbd   : > { %3041 = dma.done.wait (%p3647_p11), [#allocation9], 1024   ;;  %p3648_p9 = pmov %p3645_p7 }
  0xbe   : > { %v426_v0 = vld [vmem:[%s372_s8] sm:$0xff]  ;;  %vm430_vm0 = vcmask 261120   ;;  %v425_v2 = vld [vmem:[%s363_s24 + $0x8] sm:$0xff]  ;;  %v555_v9 = vld [vmem:[#allocation7] sm:$0xff]  ;;  %v3079_v12 = vmov 0.0|0.0   ;;  %vm3080_vm1 = vmmov 0  }
  0xbf   : > { %3043 = vsyncadd (%p3648_p9), [#allocation9], 4294966272  ;;  %v424_v1 = vld [vmem:[%s363_s24] sm:$0xff]  ;;  %v455_v3 = vmul.f32 %v426_v0, %v426_v0  ;;  %v429_v5 = vmul.f32 %v425_v2, %v425_v2  ;;  %v556_v10 = vld [vmem:[#allocation7 + $0x8] sm:$0xff]  ;;  %2635 = vmatprep.subr.bf16.mxu1 %v3079_v12  ;;  %v3081_v15 = vmov 0.0   ;;  %s3082_s16 = smov 120  }
  0xc0   : > { %v428_v4 = vmul.f32 %v424_v1, %v424_v1  ;;  %v557_v11 = vld [vmem:[#allocation7 + $0x10] sm:$0xff]  ;;  %v2636_v13 = vpack.c.bf16 %v556_v10, %v555_v9  ;;  %v558_v14 = vld [vmem:[#allocation7 + $0x18] sm:$0xff]  ;;  %2554 = vmatprep.mubr.msk.f32.mxu1 %vm3080_vm1, %v3081_v15  ;;  %v472_v19 = vld [vmem:[%s3606_s4 + $0x10] sm:$0xff]  ;;  %s3083_s24 = smov 112   ;;  %vm784_vm2 = vcmask 64512   ;;  %s3084_s0 = smov 104  }
  0xc1   : > { %v456_v6 = vsel %vm430_vm0, %v455_v3, 0.0  ;;  %v434_v7 = vsel %vm430_vm0, %v429_v5, 0.0  ;;  %v2639_v16 = vpack.c.bf16 %v558_v14, %v557_v11  ;;  %v470_v17 = vld [vmem:[%s3606_s4] sm:$0xff]  ;;  %v471_v18 = vld [vmem:[%s3606_s4 + $0x8] sm:$0xff]  ;;  %v473_v21 = vld [vmem:[%s3606_s4 + $0x18] sm:$0xff]  ;;  %s3085_s6 = smov 96  }
  0xc2   : > { %457 = vadd.xlane.f32.xlu0 %v456_v6  ;;  %435 = vadd.xlane.f32.xlu1 %v434_v7  ;;  %v431_v8 = vsel %vm430_vm0, %v428_v4, 0.0  ;;  %v2627_v20 = vpack.c.bf16 %v471_v18, %v470_v17  ;;  %v2631_v22 = vpack.c.bf16 %v473_v21, %v472_v19  ;;  %v2447_v33 = vld [vmem:[%s3605_s3] ss:$0 sm:$0xff]  ;;  %vm3492_vm3 = vmpackc.low %vm784_vm2, %vm784_vm2  ;;  %s3088_s15 = smov 8   ;;  %s3089_s8 = smov 16   ;;  %vm2071_vm4 = vcmask 130048  }
  0xc3   : > { %2637 = vmatpush3.bf16.msra.mxu1 %v2636_v13  ;;  %v2446_v38 = vld [vmem:[%s3604_s2] ss:$0 sm:$0xff]  ;;  %s3090_s11 = smov 24   ;;  %vm2074_vm5 = vcmask 195584   ;;  %s3651_s13 = sld [smem:[#allocation18_spill]] }
  0xc4   : > { %2638 = vmatprep.subr.bf16.mxu1 %v3079_v12  ;;  %2628 = vmatprep.subr.bf16.mxu0 %v2627_v20  ;;  %s421_s21 = scalar_lea.vmem [#allocation11], %s2440_s14  ;;  %s3652_s25 = sld [smem:[#allocation24_spill]] }
  0xc5   : > { %2630 = vmatpush3.bf16.msra.mxu0 %v2627_v20  ;;  %s2289_s23 = sshll.u32 %s421_s21, 4  ;;  %s2274_s22 = scalar_lea.sflag [#allocation4], %s3389_s7  ;;  %s3545_s23 = int_to_ptr.vmem [resolvable:$true] %s2289_s23 }
  0xc6   : > { %432 = vadd.xlane.f32.xlu0 %v431_v8  ;;  %2632 = vmatprep.subr.bf16.mxu0 %v2631_v22  ;;  %s2976_s14 = scalar_lea.vmem %s3545_s23, 256  ;;  %p3653_p2 = scmp.ne.s32.totalorder %s3637_s27, 0 }
  0xc7   : > { %2640 = vmatpush3.bf16.msra.mxu1 %v2639_v16  ;;  %p2977_p0 = scmp.ne.s32.totalorder %s3545_s23, %s2976_s14  ;;  %s3091_s26 = smov [#allocation11]  }
  0xc8   : > { %s2980_s17 = sshll.u32 %s3091_s26, 4  ;;  %s2981_s17 = int_to_ptr.vmem [resolvable:$false] %s2980_s17 }
  0xc9   : > { %2634 = vmatpush3.bf16.msra.mxu0 %v2631_v22  ;;  %s2487_s20 = sshll.u32 %s3651_s13, 8  ;;  %p2978_p4 = pnand %p2977_p0, %p3653_p2 }
  0xca   : > { %s3550_s5 = scalar_lea.hbm %s3652_s25, %s2487_s20  ;;  %p2983_p1 = scmp.lt.s32.totalorder %s3545_s23, %s2981_s17 }
  0xcb   : > { %p2979_p8 = pneg %p2978_p4 }
 0x14f   : > { %v458_v23 = vpop.xlane.xlu0 %457  ;;  %v436_v24 = vpop.xlane.xlu1 %435 }
 0x150   : > { %v459_v25 = vmul.f32 0.03125, %v458_v23  ;;  %v439_v26 = vmul.f32 0.03125, %v436_v24 }
 0x152   : > { %v460_v27 = vadd.f32 1e-06, %v459_v25  ;;  %v441_v28 = vadd.f32 1e-06, %v439_v26 }
 0x153   : > { %v433_v29 = vpop.xlane.xlu0 %432 }
 0x154   : > { %2786 = vrsqrt.f32 %v460_v27  ;;  %v438_v30 = vmul.f32 0.03125, %v433_v29 }
 0x155   : > { %2788 = vrsqrt.f32 %v441_v28 }
 0x156   : > { %v440_v31 = vadd.f32 1e-06, %v438_v30 }
 0x158   : > { %2790 = vrsqrt.f32 %v440_v31 }
 0x15e   : > { %v2787_v32 = vpop.eup %2786 }
 0x15f   : > { %v2789_v34 = vpop.eup %2788  ;;  %v462_v35 = vmul.f32 %v2787_v32, %v426_v0 }
 0x160   : > { %v445_v36 = vmul.f32 %v2789_v34, %v425_v2 }
 0x161   : > { %v469_v37 = vmul.f32 %v2447_v33, %v462_v35 }
 0x162   : > { %v2791_v39 = vpop.eup %2790  ;;  %v453_v41 = vmul.f32 %v2446_v38, %v445_v36 }
 0x163   : > { %2555 = vmatmul.mubr.msk.f32.vlgmr.msra.gmra.mrb[0].mxu1 %vm430_vm0, %v469_v37  ;;  %v444_v40 = vmul.f32 %v2791_v39, %v424_v1 }
 0x165   : > { %v452_v42 = vmul.f32 %v2446_v38, %v444_v40 }
 0x167   : > { %2543 = vmatprep.mubr.msk.f32.mxu0 %vm430_vm0, %v452_v42 }
 0x168   : > { %2544 = vmatmul.mubr.msk.f32.vlgmr.msra.gmra.mrb[0].mxu0 %vm430_vm0, %v453_v41 }
 0x236   : > { %v3441_v43 = vpop.f32.mrb[0].mxu1 }
 0x237   : > { %v2556_v44 = vpop.f32.mrb[1].mxu1  ;;  %647 = vrot.lane.b32.xlu1 %v3441_v43, %s3082_s16  ;;  %650 = vrot.lane.b32.xlu0 %v3441_v43, %s3083_s24 }
 0x23b   : > { %653 = vrot.lane.b32.xlu1 %v3441_v43, %s3084_s0  ;;  %v2545_v45 = vpop.f32.mrb[0].mxu0 }
 0x23c   : > { %v546_v46 = vpop.f32.mrb[1].mxu0 }
 0x23d   : > { %2559 = vmatprep.mubr.msk.f32.mxu0 %vm784_vm2, %v546_v46 }
 0x23f   : > { %636 = vrot.lane.b32.xlu1 %v2545_v45, %s3082_s16 }
 0x243   : > { %644 = vrot.lane.b32.xlu1 %v2545_v45, %s3084_s0 }
 0x247   : > { %634 = vrot.lane.b32.xlu1 %v546_v46, %s3082_s16  ;;  %s2982_s16 = scalar_lea.vmem %s2981_s17, 512 }
 0x248   : > { %p2984_p13 = scmp.lt.s32.totalorder %s2982_s16, %s2976_s14 }
 0x24a   : > { %p2985_p3 = por %p2984_p13, %p2983_p1 }
 0x24b   : > { %642 = vrot.lane.b32.xlu1 %v546_v46, %s3084_s0 }
 0x24c   : > { %p2986_p5 = pnand %p2985_p3, %p2979_p8 }
 0x255   : > { %656 = vxpose.xlu0.b32.start.end [1/1] (short) (narrow) %v3441_v43, 8 }
 0x27e   : > { %640 = vrot.lane.b32.xlu0 %v2545_v45, %s3083_s24 }
 0x282   : > { %638 = vrot.lane.b32.xlu0 %v546_v46, %s3083_s24 }
 0x2a9   : > { %v648_v47 = vpop.permute.xlu1 %647  ;;  %v3448_v48 = vpop.permute.xlu0 %650 }
 0x2aa   : > { %688 = vxpose.xlu1.b32.start.end [1/1] (short) (narrow) %v648_v47, 8  ;;  %720 = vxpose.xlu0.b32.start.end [1/1] (short) (narrow) %v3448_v48, 8 }
 0x2ad   : > { %v3451_v49 = vpop.permute.xlu1 %653 }
 0x2ae   : > { %752 = vxpose.xlu0.b32.start.end [1/1] (short) (narrow) %v3451_v49, 8 }
 0x2b1   : > { %v637_v50 = vpop.permute.xlu1 %636 }
 0x2b5   : > { %v645_v51 = vpop.permute.xlu1 %644 }
 0x2b9   : > { %v635_v52 = vpop.permute.xlu1 %634 }
 0x2ba   : > { %2564 = vmatprep.mubr.msk.f32.mxu1 %vm784_vm2, %v635_v52 }
 0x2bd   : > { %v643_v56 = vpop.permute.xlu1 %642 }
 0x2d5   : > { %v672_v53 = vpop.trf.xlu0 }
 0x2d6   : > { %2557 = vmatprep.subr.mxu0 %v672_v53 }
 0x2d7   : > { %2558 = vmatpush3.msra.mxu0 %v672_v53 }
 0x2d8   : > { %2560 = vmatmul.mubr.msk.f32.vlgmr.msra.gmra.mrb[2].mxu0 %vm784_vm2, %v2545_v45 }
 0x2f0   : > { %v641_v54 = vpop.permute.xlu0 %640 }
 0x2f4   : > { %v639_v55 = vpop.permute.xlu0 %638 }
 0x2f5   : > { %2569 = vmatprep.mubr.msk.f32.mxu0 %vm784_vm2, %v639_v55 }
 0x32a   : > { %v704_v57 = vpop.trf.xlu1  ;;  %v736_v58 = vpop.trf.xlu0 }
 0x32b   : > { %2562 = vmatprep.subr.mxu1 %v704_v57  ;;  %2567 = vmatprep.subr.mxu0 %v736_v58 }
 0x32c   : > { %2563 = vmatpush3.msra.mxu1 %v704_v57  ;;  %2568 = vmatpush3.msra.mxu0 %v736_v58 }
 0x32d   : > { %2565 = vmatmul.mubr.msk.f32.vlgmr.msra.gmra.mrb[2].mxu1 %vm784_vm2, %v637_v50  ;;  %2570 = vmatmul.mubr.msk.f32.vlgmr.msra.gmra.mrb[4].mxu0 %vm784_vm2, %v641_v54 }
 0x32e   : > { %2574 = vmatprep.mubr.msk.f32.mxu1 %vm784_vm2, %v643_v56  ;;  %v768_v59 = vpop.trf.xlu0  ;;  %2641 = vmatprep.subr.bf16.mxu0 %v3079_v12 }
 0x32f   : > { %2572 = vmatprep.subr.mxu1 %v768_v59  ;;  %2581 = vmatprep.mubr.msk.f32.mxu0 %vm3080_vm1, %v3081_v15 }
 0x330   : > { %2573 = vmatpush3.msra.mxu1 %v768_v59 }
 0x331   : > { %2575 = vmatmul.mubr.msk.f32.vlgmr.msra.gmra.mrb[4].mxu1 %vm784_vm2, %v645_v51  ;;  %2645 = vmatprep.subr.bf16.mxu1 %v3079_v12 }
 0x332   : > { %2588 = vmatprep.mubr.msk.f32.mxu1 %vm3080_vm1, %v3081_v15 }
 0x3ab   : > { %v2561_v60 = vpop.f32.mrb[2].mxu0 }
 0x3ac   : > { %v855_v61 = vpop.f32.mrb[3].mxu0  ;;  %v1104_v62 = vsel %vm784_vm2, %v2561_v60, -inf }
 0x3ad   : > { %1105 = vmax.xlane.f32.xlu1 %v1104_v62  ;;  %v1101_v63 = vsel %vm784_vm2, %v855_v61, -inf }
 0x3ae   : > { %1102 = vmax.xlane.f32.xlu0 %v1101_v63 }
 0x400   : > { %v2566_v0 = vpop.f32.mrb[2].mxu1  ;;  %v2571_v1 = vpop.f32.mrb[4].mxu0 }
 0x401   : > { %v934_v2 = vpop.f32.mrb[3].mxu1  ;;  %v1013_v3 = vpop.f32.mrb[5].mxu0  ;;  %v1110_v4 = vsel %vm784_vm2, %v2566_v0, -inf  ;;  %v1116_v8 = vsel %vm784_vm2, %v2571_v1, -inf }
 0x402   : > { %1111 = vmax.xlane.f32.xlu1 %v1110_v4  ;;  %v1107_v5 = vsel %vm784_vm2, %v934_v2, -inf  ;;  %v1113_v9 = vsel %vm784_vm2, %v1013_v3, -inf }
 0x403   : > { %1108 = vmax.xlane.f32.xlu0 %v1107_v5 }
 0x404   : > { %v2576_v6 = vpop.f32.mrb[4].mxu1 }
 0x405   : > { %v1092_v7 = vpop.f32.mrb[5].mxu1  ;;  %v1122_v10 = vsel %vm784_vm2, %v2576_v6, -inf }
 0x406   : > { %1117 = vmax.xlane.f32.xlu1 %v1116_v8  ;;  %v1119_v11 = vsel %vm784_vm2, %v1092_v7, -inf }
 0x407   : > { %1114 = vmax.xlane.f32.xlu0 %v1113_v9 }
 0x40a   : > { %1123 = vmax.xlane.f32.xlu1 %v1122_v10 }
 0x40b   : > { %1120 = vmax.xlane.f32.xlu0 %v1119_v11 }
 0x41b   : > { %1191 = vrot.lane.b32.xlu1 %v648_v47, %s3085_s6 }
 0x421   : > { %1189 = vrot.lane.b32.xlu0 %v3441_v43, %s3085_s6 }
 0x43a   : > { %v1106_v13 = vpop.xlane.xlu1 %1105 }
 0x43b   : > { %v1126_v14 = vsub.f32 %v2561_v60, %v1106_v13  ;;  %v1103_v16 = vpop.xlane.xlu0 %1102 }
 0x43c   : > { %v1125_v17 = vsub.f32 %v855_v61, %v1103_v16 }
 0x43d   : > { %v1135_v18 = vmul.f32 1.442695, %v1126_v14 }
 0x43e   : > { %v1133_v19 = vmul.f32 1.442695, %v1125_v17 }
 0x43f   : > { %2792 = vpow2.f32 %v1135_v18 }
 0x440   : > { %2794 = vpow2.f32 %v1133_v19 }
 0x449   : > { %v2793_v20 = vpop.eup %2792 }
 0x44a   : > { %v2795_v21 = vpop.eup %2794  ;;  %v1152_v22 = vsel %vm784_vm2, %v2793_v20, 0.0 }
 0x44b   : > { %1153 = vadd.xlane.f32.xlu1 %v1152_v22  ;;  %v1149_v23 = vsel %vm784_vm2, %v2795_v21, 0.0 }
 0x44c   : > { %1150 = vadd.xlane.f32.xlu0 %v1149_v23 }
 0x48f   : > { %v1112_v24 = vpop.xlane.xlu1 %1111 }
 0x490   : > { %v1128_v25 = vsub.f32 %v2566_v0, %v1112_v24  ;;  %v1109_v26 = vpop.xlane.xlu0 %1108 }
 0x491   : > { %v1127_v28 = vsub.f32 %v934_v2, %v1109_v26 }
 0x492   : > { %v1139_v27 = vmul.f32 1.442695, %v1128_v25 }
 0x493   : > { %v1118_v29 = vpop.xlane.xlu1 %1117  ;;  %v1137_v33 = vmul.f32 1.442695, %v1127_v28 }
 0x494   : > { %2796 = vpow2.f32 %v1139_v27  ;;  %v1130_v30 = vsub.f32 %v2571_v1, %v1118_v29  ;;  %v1115_v31 = vpop.xlane.xlu0 %1114 }
 0x495   : > { %v1129_v32 = vsub.f32 %v1013_v3, %v1115_v31 }
 0x496   : > { %v1143_v34 = vmul.f32 1.442695, %v1130_v30 }
 0x497   : > { %v1141_v35 = vmul.f32 1.442695, %v1129_v32  ;;  %v1124_v36 = vpop.xlane.xlu1 %1123 }
 0x498   : > { %2798 = vpow2.f32 %v1143_v34  ;;  %v1132_v37 = vsub.f32 %v2576_v6, %v1124_v36  ;;  %v1121_v38 = vpop.xlane.xlu0 %1120 }
 0x499   : > { %2800 = vpow2.f32 %v1141_v35  ;;  %v1131_v39 = vsub.f32 %v1092_v7, %v1121_v38  ;;  %v3086_v38 = vmov 1983009808  }
 0x49a   : > { %2802 = vpow2.f32 %v1137_v33  ;;  %v1147_v40 = vmul.f32 1.442695, %v1132_v37 }
 0x49b   : > { %v1145_v41 = vmul.f32 1.442695, %v1131_v39  ;;  %v1192_v56 = vpop.permute.xlu1 %1191  ;;  %v1776_v39 = vunpack.c.l.s4 %v3086_v38 }
 0x49c   : > { %2804 = vpow2.f32 %v1147_v40  ;;  %v1190_v57 = vpop.permute.xlu0 %1189  ;;  %v1778_v40 = vlaneseq }
 0x49d   : > { %2806 = vpow2.f32 %v1145_v41 }
 0x49e   : > { %v2797_v42 = vpop.eup %2796 }
 0x49f   : > { %v1158_v43 = vsel %vm784_vm2, %v2797_v42, 0.0 }
 0x4a0   : > { %1159 = vadd.xlane.f32.xlu1 %v1158_v43 }
 0x4a2   : > { %v2799_v44 = vpop.eup %2798 }
 0x4a3   : > { %v2801_v45 = vpop.eup %2800  ;;  %v1164_v46 = vsel %vm784_vm2, %v2799_v44, 0.0 }
 0x4a4   : > { %v2803_v47 = vpop.eup %2802  ;;  %1165 = vadd.xlane.f32.xlu0 %v1164_v46  ;;  %v1161_v50 = vsel %vm784_vm2, %v2801_v45, 0.0 }
 0x4a5   : > { %1162 = vadd.xlane.f32.xlu1 %v1161_v50  ;;  %v1155_v52 = vsel %vm784_vm2, %v2803_v47, 0.0 }
 0x4a6   : > { %v2805_v51 = vpop.eup %2804 }
 0x4a7   : > { %v1170_v53 = vsel %vm784_vm2, %v2805_v51, 0.0  ;;  %v2807_v54 = vpop.eup %2806 }
 0x4a8   : > { %1156 = vadd.xlane.f32.xlu0 %v1155_v52  ;;  %v1167_v55 = vsel %vm784_vm2, %v2807_v54, 0.0 }
 0x4a9   : > { %1171 = vadd.xlane.f32.xlu1 %v1170_v53 }
 0x4ac   : > { %1168 = vadd.xlane.f32.xlu0 %v1167_v55 }
 0x4ba   : > { %1195 = vrot.lane.b32.xlu1 %v3451_v49, %s3085_s6 }
 0x4c2   : > { %1193 = vrot.lane.b32.xlu0 %v3448_v48, %s3085_s6 }
 0x4d8   : > { %v1154_v58 = vpop.xlane.xlu1 %1153 }
 0x4d9   : > { %2808 = vrcp.f32 %v1154_v58  ;;  %v1151_v59 = vpop.xlane.xlu0 %1150 }
 0x4da   : > { %2810 = vrcp.f32 %v1151_v59 }
 0x4e0   : > { %1233 = vxpose.xlu0.b32.start.end [1/1] (short) (narrow) %v1192_v56, 8 }
 0x4e3   : > { %v2809_v60 = vpop.eup %2808  ;;  %1201 = vxpose.xlu1.b32.start.end [1/1] (short) (narrow) %v1190_v57, 8 }
 0x4e4   : > { %v2811_v61 = vpop.eup %2810  ;;  %v1182_v62 = vmul.f32 %v2809_v60, %v2793_v20 }
 0x4e5   : > { %v1181_v63 = vmul.f32 %v2811_v61, %v2795_v21 }
 0x4e7   : > { %v2642_v49 = vpack.c.bf16 %v1182_v62, %v1181_v63 }
 0x4e9   : > { %2644 = vmatpush3.bf16.xpose.msk.msra.mxu0 %vm3492_vm3, %v2642_v49 }
 0x4ea   : > { %2649 = vmatprep.subr.bf16.mxu0 %v3079_v12 }
 0x52d   : > { %v1160_v48 = vpop.xlane.xlu1 %1159 }
 0x52e   : > { %2812 = vrcp.f32 %v1160_v48 }
 0x531   : > { %v1166_v1 = vpop.xlane.xlu0 %1165 }
 0x532   : > { %v1163_v2 = vpop.xlane.xlu1 %1162 }
 0x535   : > { %v1157_v3 = vpop.xlane.xlu0 %1156 }
 0x536   : > { %2814 = vrcp.f32 %v1157_v3  ;;  %v1172_v5 = vpop.xlane.xlu1 %1171 }
 0x538   : > { %v2813_v7 = vpop.eup %2812 }
 0x539   : > { %v1169_v4 = vpop.xlane.xlu0 %1168  ;;  %v1184_v9 = vmul.f32 %v2813_v7, %v2797_v42  ;;  %v3087_v42 = vmov 1934713408  }
 0x53a   : > { %v1196_v11 = vpop.permute.xlu1 %1195  ;;  %2816 = vrcp.f32 %v1169_v4  ;;  %v1808_v43 = vunpack.c.l.s4 %v3087_v42 }
 0x53b   : > { %2818 = vrcp.f32 %v1166_v1 }
 0x53c   : > { %2820 = vrcp.f32 %v1172_v5 }
 0x53d   : > { %v1194_v6 = vpop.permute.xlu0 %1193  ;;  %2822 = vrcp.f32 %v1163_v2 }
 0x53e   : > { %1265 = vxpose.xlu0.b32.start.end [1/1] (short) (narrow) %v1194_v6, 8 }
 0x540   : > { %v2815_v8 = vpop.eup %2814 }
 0x541   : > { %v1183_v10 = vmul.f32 %v2815_v8, %v2803_v47  ;;  %v1809_v47 = vunpack.c.0.s8 %v1808_v43  ;;  %v2077_v43 = vld [vmem:[#allocation8] sm:$0xff] }
 0x542   : > { %1297 = vxpose.xlu0.b32.start.end [1/1] (short) (narrow) %v1196_v11, 8 }
 0x543   : > { %v2646_v13 = vpack.c.bf16 %v1184_v9, %v1183_v10 }
 0x544   : > { %v2817_v14 = vpop.eup %2816 }
 0x545   : > { %2648 = vmatpush3.bf16.xpose.msk.msra.mxu1 %vm3492_vm3, %v2646_v13  ;;  %v2819_v16 = vpop.eup %2818  ;;  %v1187_v19 = vmul.f32 %v2817_v14, %v2807_v54 }
 0x546   : > { %2653 = vmatprep.subr.bf16.mxu1 %v3079_v12  ;;  %v2821_v17 = vpop.eup %2820  ;;  %v1186_v21 = vmul.f32 %v2819_v16, %v2799_v44  ;;  %v1777_v44 = vunpack.c.0.s8 %v1776_v39 }
 0x547   : > { %v2823_v18 = vpop.eup %2822  ;;  %v1188_v20 = vmul.f32 %v2821_v17, %v2805_v51 }
 0x548   : > { %v1185_v22 = vmul.f32 %v2823_v18, %v2801_v45  ;;  %v1779_v45 = vshrl.u32 %v1778_v40, 7 }
 0x549   : > { %v2654_v24 = vpack.c.bf16 %v1188_v20, %v1187_v19 }
 0x54a   : > { %v2650_v25 = vpack.c.bf16 %v1186_v21, %v1185_v22  ;;  %v1780_v50 = vsub.s32 %v1777_v44, %v1779_v45  ;;  %v3514_v57 = vsub.s32 %v1809_v47, %v1779_v45  ;;  %v2078_v44 = vld [vmem:[#allocation8 + $0x8] sm:$0xff] }
 0x560   : > { %v1249_v23 = vpop.trf.xlu0 }
 0x561   : > { %2589 = vmatmul.mubr.msk.f32.vlgmr.msra.gmra.mrb[6].mxu1 %vm784_vm2, %v1249_v23 }
 0x562   : > { %2656 = vmatpush3.bf16.xpose.msk.msra.mxu1 %vm3492_vm3, %v2654_v24  ;;  %2602 = vmatprep.mubr.msk.f32.mxu1 %vm3080_vm1, %v3081_v15 }
 0x563   : > { %v1217_v12 = vpop.trf.xlu1 }
 0x564   : > { %2582 = vmatmul.mubr.msk.f32.vlgmr.msra.gmra.mrb[6].mxu0 %vm784_vm2, %v1217_v12 }
 0x565   : > { %2652 = vmatpush3.bf16.xpose.msk.msra.mxu0 %vm3492_vm3, %v2650_v25  ;;  %2595 = vmatprep.mubr.msk.f32.mxu0 %vm3080_vm1, %v3081_v15 }
 0x5be   : > { %v1281_v26 = vpop.trf.xlu0 }
 0x5bf   : > { %2596 = vmatmul.mubr.msk.f32.vlgmr.msra.gmra.mrb[8].mxu0 %vm784_vm2, %v1281_v26 }
 0x5c2   : > { %v1313_v27 = vpop.trf.xlu0 }
 0x5c3   : > { %2603 = vmatmul.mubr.msk.f32.vlgmr.msra.gmra.mrb[8].mxu1 %vm784_vm2, %v1313_v27 }
 0x634   : > { %v1483_v28 = vpop.f32.mrb[6].mxu1 }
 0x635   : > { %1677 = vxpose.xlu0.b32.start.end [1/1] (short) (narrow) %v1483_v28, 16  ;;  %v2590_v29 = vpop.f32.mrb[7].mxu1 }
 0x637   : > { %v1404_v30 = vpop.f32.mrb[6].mxu0 }
 0x638   : > { %1645 = vxpose.xlu1.b32.start.end [1/1] (short) (narrow) %v1404_v30, 16  ;;  %v2583_v31 = vpop.f32.mrb[7].mxu0 }
 0x692   : > { %v1562_v32 = vpop.f32.mrb[8].mxu0 }
 0x693   : > { %1709 = vxpose.xlu1.b32.start.end [1/1] (short) (narrow) %v1562_v32, 16  ;;  %v2597_v33 = vpop.f32.mrb[9].mxu0 }
 0x696   : > { %v1641_v34 = vpop.f32.mrb[8].mxu1 }
 0x697   : > { %1741 = vxpose.xlu0.b32.start.end [1/1] (short) (narrow) %v1641_v34, 16  ;;  %v2604_v35 = vpop.f32.mrb[9].mxu1 }
 0x6b5   : > { %v1693_v15 = vpop.trf.xlu0 }
 0x6b8   : > { %v1661_v36 = vpop.trf.xlu1 }
 0x6b9   : > { %v1694_v41 = vpop.trf.xlu0 }
 0x6bc   : > { %v1662_v37 = vpop.trf.xlu1 }
 0x713   : > { %v1725_v46 = vpop.trf.xlu1 }
 0x714   : > { %v1773_v51 = vcombine.low %v1661_v36, %v1725_v46  ;;  %v1774_v52 = vcombine.high %v1661_v36, %v1725_v46 }
 0x716   : > { %v1781_v58 = vrot.slane %v1773_v51, %v1780_v50  ;;  %v1788_v59 = vrot.slane %v1774_v52, %v1780_v50  ;;  %v2079_v52 = vld [vmem:[#allocation8 + $0x10] sm:$0xff] }
 0x717   : > { %v1757_v53 = vpop.trf.xlu0  ;;  %v1726_v54 = vpop.trf.xlu1 }
 0x718   : > { %v1789_v55 = vcombine.low %v1693_v15, %v1757_v53  ;;  %v1790_v56 = vcombine.high %v1693_v15, %v1757_v53  ;;  %v1841_v62 = vcombine.low %v1662_v37, %v1726_v54  ;;  %v1842_v63 = vcombine.high %v1662_v37, %v1726_v54  ;;  %v2080_v53 = vld [vmem:[#allocation8 + $0x18] sm:$0xff] }
 0x71a   : > { %v1797_v60 = vrot.slane %v1789_v55, %v1780_v50  ;;  %v1804_v61 = vrot.slane %v1790_v56, %v1780_v50  ;;  %v1849_v9 = vrot.slane %v1841_v62, %v1780_v50  ;;  %v1856_v10 = vrot.slane %v1842_v63, %v1780_v50 }
 0x71b   : > { %v1758_v0 = vpop.trf.xlu0  ;;  %v2657_v56 = vpack.c.bf16 %v2078_v44, %v2077_v43 }
 0x71c   : > { %v1805_v49 = vcombine.low %v1781_v58, %v1797_v60  ;;  %v1806_v48 = vcombine.high %v1781_v58, %v1797_v60  ;;  %v1821_v1 = vcombine.low %v1788_v59, %v1804_v61  ;;  %v1822_v2 = vcombine.high %v1788_v59, %v1804_v61 }
 0x71d   : > { %v1857_v3 = vcombine.low %v1694_v41, %v1758_v0  ;;  %v1858_v4 = vcombine.high %v1694_v41, %v1758_v0  ;;  %v2661_v58 = vpack.c.bf16 %v2080_v53, %v2079_v52  ;;  %2658 = vmatprep.subr.bf16.mxu0 %v2657_v56 }
 0x71e   : > { %v1813_v5 = vrot.slane %v1805_v49, %v3514_v57  ;;  %v1820_v6 = vrot.slane %v1806_v48, %v3514_v57  ;;  %v1829_v7 = vrot.slane %v1821_v1, %v3514_v57  ;;  %v1836_v8 = vrot.slane %v1822_v2, %v3514_v57  ;;  %2660 = vmatpush3.bf16.msra.mxu0 %v2657_v56 }
 0x71f   : > { %v1865_v11 = vrot.slane %v1857_v3, %v1780_v50  ;;  %v1872_v13 = vrot.slane %v1858_v4, %v1780_v50  ;;  %2662 = vmatprep.subr.bf16.mxu0 %v2661_v58 }
 0x720   : > { %v1909_v14 = vcombine.low %v1813_v5, %v1820_v6  ;;  %v2471_v16 = vcombine.high %v1813_v5, %v1820_v6  ;;  %v1925_v17 = vcombine.low %v1829_v7, %v1836_v8  ;;  %v2472_v18 = vcombine.high %v1829_v7, %v1836_v8 }
 0x721   : > { %v1873_v19 = vcombine.low %v1849_v9, %v1865_v11  ;;  %v1874_v20 = vcombine.high %v1849_v9, %v1865_v11  ;;  %v1889_v21 = vcombine.low %v1856_v10, %v1872_v13  ;;  %v1890_v22 = vcombine.high %v1856_v10, %v1872_v13 }
 0x722   : > { %v1916_v23 = vrot.slane %v1909_v14, %v1780_v50  ;;  %v1924_v24 = vrot.slane %v2471_v16, %v1780_v50  ;;  %v1932_v12 = vrot.slane %v1925_v17, %v1780_v50  ;;  %v1940_v25 = vrot.slane %v2472_v18, %v1780_v50  ;;  %2664 = vmatpush3.bf16.msra.mxu0 %v2661_v58  ;;  %v2186_v17 = vld [vmem:[#allocation10] sm:$0xff]  ;;  %v2187_v18 = vld [vmem:[#allocation10 + $0x8] sm:$0xff] }
 0x723   : > { %v1881_v26 = vrot.slane %v1873_v19, %v3514_v57  ;;  %v1888_v27 = vrot.slane %v1874_v20, %v3514_v57  ;;  %v1897_v28 = vrot.slane %v1889_v21, %v3514_v57  ;;  %v1904_v29 = vrot.slane %v1890_v22, %v3514_v57 }
 0x724   : > { %v1941_v30 = vcombine.low %v1916_v23, %v1924_v24  ;;  %v1957_v31 = vcombine.low %v1932_v12, %v1940_v25  ;;  %v1942_v32 = vcombine.high %v1916_v23, %v1924_v24  ;;  %v1958_v33 = vcombine.high %v1932_v12, %v1940_v25 }
 0x725   : > { %v1977_v34 = vcombine.low %v1881_v26, %v1888_v27  ;;  %v2473_v35 = vcombine.high %v1881_v26, %v1888_v27  ;;  %v1993_v36 = vcombine.low %v1897_v28, %v1904_v29  ;;  %v2474_v15 = vcombine.high %v1897_v28, %v1904_v29  ;;  %v2188_v26 = vld [vmem:[#allocation10 + $0x10] sm:$0xff]  ;;  %v2189_v27 = vld [vmem:[#allocation10 + $0x18] sm:$0xff] }
 0x726   : > { %v1949_v37 = vrot.slane %v1941_v30, %v3514_v57  ;;  %v1965_v38 = vrot.slane %v1957_v31, %v3514_v57  ;;  %v1956_v46 = vrot.slane %v1942_v32, %v3514_v57  ;;  %v1972_v47 = vrot.slane %v1958_v33, %v3514_v57 }
 0x727   : > { %v1984_v39 = vrot.slane %v1977_v34, %v1780_v50  ;;  %v1992_v40 = vrot.slane %v2473_v35, %v1780_v50  ;;  %v2000_v41 = vrot.slane %v1993_v36, %v1780_v50  ;;  %v2008_v42 = vrot.slane %v2474_v15, %v1780_v50 }
 0x728   : > { %v1974_v45 = vcombine.high %v1949_v37, %v1965_v38  ;;  %v1973_v51 = vcombine.low %v1949_v37, %v1965_v38  ;;  %v1975_v60 = vcombine.low %v1956_v46, %v1972_v47  ;;  %v1976_v49 = vcombine.high %v1956_v46, %v1972_v47 }
 0x729   : > { %v2009_v54 = vcombine.low %v1984_v39, %v1992_v40  ;;  %v2025_v55 = vcombine.low %v2000_v41, %v2008_v42  ;;  %v2010_v61 = vcombine.high %v1984_v39, %v1992_v40  ;;  %v2026_v62 = vcombine.high %v2000_v41, %v2008_v42 }
 0x72a   : > { %2047 = vrot.lane.b32.xlu1 %v1974_v45, %s3088_s15  ;;  %v2665_v19 = vpack.c.bf16 %v2187_v18, %v2186_v17  ;;  %v2669_v29 = vpack.c.bf16 %v2189_v27, %v2188_v26 }
 0x72b   : > { %v2017_v59 = vrot.slane %v2009_v54, %v3514_v57  ;;  %v2033_v50 = vrot.slane %v2025_v55, %v3514_v57  ;;  %v2024_v48 = vrot.slane %v2010_v61, %v3514_v57  ;;  %v2040_v1 = vrot.slane %v2026_v62, %v3514_v57 }
 0x72c   : > { %2666 = vmatprep.subr.bf16.mxu1 %v2665_v19 }
 0x72d   : > { %v2042_v63 = vcombine.high %v2017_v59, %v2033_v50  ;;  %v2041_v0 = vcombine.low %v2017_v59, %v2033_v50  ;;  %v2043_v2 = vcombine.low %v2024_v48, %v2040_v1  ;;  %v2044_v3 = vcombine.high %v2024_v48, %v2040_v1  ;;  %2668 = vmatpush3.bf16.msra.mxu1 %v2665_v19 }
 0x72e   : > { %2055 = vrot.lane.b32.xlu1 %v1975_v60, %s3089_s8  ;;  %2670 = vmatprep.subr.bf16.mxu1 %v2669_v29 }
 0x72f   : > { %2049 = vrot.lane.b32.xlu0 %v2042_v63, %s3088_s15 }
 0x731   : > { %2672 = vmatpush3.bf16.msra.mxu1 %v2669_v29 }
 0x732   : > { %2063 = vrot.lane.b32.xlu1 %v1976_v49, %s3090_s11 }
 0x736   : > { %2057 = vrot.lane.b32.xlu1 %v2043_v2, %s3089_s8 }
 0x73a   : > { %2065 = vrot.lane.b32.xlu1 %v2044_v3, %s3090_s11 }
 0x79c   : > { %v2048_v4 = vpop.permute.xlu1 %2047 }
 0x79d   : > { %v2069_v6 = vsel %vm784_vm2, %v1973_v51, %v2048_v4 }
 0x7a0   : > { %v2056_v5 = vpop.permute.xlu1 %2055 }
 0x7a1   : > { %v2072_v7 = vsel %vm2071_vm4, %v2069_v6, %v2056_v5  ;;  %v2050_v10 = vpop.permute.xlu0 %2049 }
 0x7a2   : > { %v2070_v11 = vsel %vm784_vm2, %v2041_v0, %v2050_v10 }
 0x7a4   : > { %v2064_v8 = vpop.permute.xlu1 %2063 }
 0x7a5   : > { %v2075_v9 = vsel %vm2074_vm5, %v2072_v7, %v2064_v8 }
 0x7a6   : > { %2613 = vmatprep.mubr.msk.f32.mxu0 %vm430_vm0, %v2075_v9 }
 0x7a8   : > { %v2058_v57 = vpop.permute.xlu1 %2057 }
 0x7a9   : > { %v2073_v13 = vsel %vm2071_vm4, %v2070_v11, %v2058_v57 }
 0x7ac   : > { %v2066_v14 = vpop.permute.xlu1 %2065 }
 0x7ad   : > { %v2076_v16 = vsel %vm2074_vm5, %v2073_v13, %v2066_v14 }
 0x7ae   : > { %2614 = vmatmul.mubr.msk.f32.vlgmr.msra.gmra.mrb[10].mxu0 %vm430_vm0, %v2076_v16 }
 0x881   : > { %v2615_v20 = vpop.f32.mrb[10].mxu0 }
 0x882   : > { %v2478_v21 = vmul.f32 -1.442695, %v2615_v20  ;;  %v2153_v22 = vpop.f32.mrb[11].mxu0 }
 0x883   : > { %v2477_v23 = vmul.f32 -1.442695, %v2153_v22 }
 0x884   : > { %2824 = vpow2.f32 %v2478_v21 }
 0x885   : > { %2826 = vpow2.f32 %v2477_v23 }
 0x88e   : > { %v2825_v24 = vpop.eup %2824 }
 0x88f   : > { %v2827_v12 = vpop.eup %2826  ;;  %v2169_v25 = vadd.f32 1.0, %v2825_v24 }
 0x890   : > { %v2168_v28 = vadd.f32 1.0, %v2827_v12 }
 0x891   : > { %2828 = vrcp.f32 %v2169_v25 }
 0x892   : > { %2830 = vrcp.f32 %v2168_v28 }
 0x89b   : > { %v2829_v30 = vpop.eup %2828 }
 0x89c   : > { %v2831_v31 = vpop.eup %2830  ;;  %v2175_v32 = vmul.f32 %v2829_v30, %v2615_v20 }
 0x89d   : > { %v2174_v33 = vmul.f32 %v2831_v31, %v2153_v22 }
 0x89e   : > { %2180 = vrot.lane.b32.xlu1 %v2175_v32, %s3085_s6 }
 0x89f   : > { %2178 = vrot.lane.b32.xlu0 %v2174_v33, %s3085_s6 }
 0x910   : > { %v2181_v34 = vpop.permute.xlu1 %2180 }
 0x911   : > { %v2179_v35 = vpop.permute.xlu0 %2178  ;;  %v2185_v15 = vmul.f32 %v2615_v20, %v2181_v34 }
 0x912   : > { %v2184_v36 = vmul.f32 %v2179_v35, %v2153_v22 }
 0x914   : > { %2624 = vmatprep.mubr.msk.f32.mxu1 %vm430_vm0, %v2184_v36 }
 0x915   : > { %2625 = vmatmul.mubr.msk.f32.vlgmr.msra.gmra.mrb[10].mxu1 %vm430_vm0, %v2185_v15 }
 0x9e8   : > { %v2626_v37 = vpop.f32.mrb[10].mxu1 }
 0x9e9   : > { %2272 = vst.msk [vmem:[%s421_s21 + $0x8] sm:$0xff] %vm430_vm0, %v2626_v37  ;;  %v2262_v38 = vpop.f32.mrb[11].mxu1 }
 0x9ea   : > { %2271 = vst.msk [vmem:[%s421_s21] sm:$0xff] %vm430_vm0, %v2262_v38 }
 0x9eb   : > { %2989 = shalt.err (!%p2986_p5)
}
 0x9ec   : > { %s2990_s24 = scalar_lea.hbm %s3550_s5, 256  ;;  %s2994_s8 = scalar_lea.hbm %s3652_s25, 512 }
 0x9ed   : > { %p2991_p6 = scmp.ne.s32.totalorder %s3550_s5, %s2990_s24  ;;  %p2995_p12 = scmp.lt.u32.totalorder %s3550_s5, %s3652_s25 }
 0x9ee   : > { %p2996_p11 = scmp.lt.u32.totalorder %s2994_s8, %s2990_s24  ;;  %p2998_p0 = scmp.lt.u32.totalorder %s2990_s24, %s3550_s5 }
 0x9ef   : > { %p2992_p10 = pnand %p2991_p6, %p3653_p2 }
 0x9f0   : > { %p2997_p9 = por %p2996_p11, %p2995_p12 }
 0x9f1   : > { %p2993_p7 = pneg %p2992_p10 }
 0x9f2   : > { %p2999_p4 = por %p2998_p0, %p2997_p9 }
 0x9f4   : > { %p3000_p8 = pnand %p2999_p4, %p2993_p7 }
 0x9f6   : > { %3003 = shalt.err (!%p3000_p8)
}
 0x9f7   : > { %s3092_s21 = smov 128  }
 0x9f8   : > { %2689 = dma.vmem_to_hbm [thread:$0]  (%p3653_p2), %s3545_s23, 256, %s3550_s5, %s2274_s22, %s3092_s21, %s3092_s21, %s3088_s15  }
 0x9f9 PF: > { %s3654_s20 = sld [smem:[#allocation17_spill]]  ;;  %s3655_s19 = sld [smem:[#allocation19_spill]] }
 0x9fa   : > { %p3657_p13 = scmp.ge.s32.totalorder %s3070_s10, 2 }
 0x9ff   : > { %s2304_s30 = sand.u32 1, %s3654_s20   ;;  %p3656_p1 = scmp.ne.s32.totalorder %s3655_s19, 0 }
 0xa00   : > { %s2305_s14 = scalar_lea.sflag [#allocation4], %s2304_s30 }
 0xa01   : > { %p2709_p3 = pnand %p3657_p13, %p3656_p1 }
 0xa03   : > { %3045 = dma.done.wait (!%p2709_p3), %s2305_s14, 256  }
 0xa04   : > { %3047 = vsyncadd (!%p2709_p3), %s2305_s14, 4294967040  ;;  %s28_s10 = sadd.s32 1, %s3070_s10   ;;  %s3658_s27 = smov %s3054_s28 }
 0xa05   : > { %p25_p5 = scmp.ge.s32.totalorder %s28_s10, 4   ;;  %s3659_s28 = smov %s3058_s29 }
 0xa06   : > { %s3660_s29 = smov %s3309_s12  ;;  %s3661_s30 = smov %s3066_s9 }
 0xa07   : > { %s3662_s9 = smov %s3664_s18  ;;  %27 = sbr.rel (!%p25_p5) target bundleno = 15 (0xf), region = 122 }
 0xa0e   :  { %2310 = vsyncpa [#allocation3], 1 }
 0xa0f   :  { %2312 = vsyncpa [#allocation3 + $0x1], 1 }
 0xa10   :  { %2313 = vsyncpa [#allocation6], 1 }
 0xa11   :  { %2315 = vsyncpa [#allocation6 + $0x1], 1 }
 0xa12   :  { %2316 = vsyncpa [#allocation9], 1 }
 0xa13   :  { %2317 = vsyncpa [#allocation4], 1 }
 0xa14   :  { %2319 = vsyncpa [#allocation4 + $0x1], 1 }

</bundles_post_ra>
